<compile_context>
chip_gen: v5e
topology: v5e:2x2
jax: 0.10.0
libtpu: 0.0.40
codegen_flags: <defaults>
</compile_context>

<pallas_src>
import functools
import math

import jax
import jax.numpy as jnp
from jax.experimental import pallas as pl
from jax.experimental.pallas import tpu as pltpu

LANE = 128
FUSE_MAX_NPAD = 1024            # single fused full-block kernel up to this padded N
RESIDENT_MAX_BYTES = 16 << 20   # keep XW1 / P fully VMEM-resident up to this size


def _round_up(x, m):
    return (x + m - 1) // m * m


# --------------------------------------------------------------------------- #
# fused small-graph kernel: both layers + softmax in a single full-block launch
# --------------------------------------------------------------------------- #
def _fused_kernel(a_ref, xw1_ref, b1_ref, w2_ref, b2_ref, out_ref, *, opo):
    a = a_ref[...]
    h = jnp.dot(a, xw1_ref[...], preferred_element_type=jnp.float32) + b1_ref[...]
    h = jnp.maximum(h, 0.0)
    p = jnp.dot(h, w2_ref[...], preferred_element_type=jnp.float32)
    z = jnp.dot(a, p, preferred_element_type=jnp.float32) + b2_ref[...]
    # padded feature lanes never enter the softmax
    col = jax.lax.broadcasted_iota(jnp.int32, z.shape, 1)
    z = jnp.where(col < opo, z, -jnp.inf)
    z = z - jnp.max(z, axis=1, keepdims=True)
    e = jnp.exp(z)
    out_ref[...] = (e / jnp.sum(e, axis=1, keepdims=True)).astype(out_ref.dtype)


# --------------------------------------------------------------------------- #
# tiled large-graph kernels (row tiles parallel, node-reduction arbitrary)
# --------------------------------------------------------------------------- #
def _layer1_kernel(a_ref, xw1_ref, b1_ref, w2_ref, p_ref, acc_ref, *, tk, resident):
    """P = ReLU((A @ XW1) + b1) @ W2, accumulating A @ XW1 over the k axis."""
    k = pl.program_id(1)

    @pl.when(k == 0)
    def _():
        acc_ref[...] = jnp.zeros_like(acc_ref)

    if resident:
        xw1 = xw1_ref[pl.ds(pl.multiple_of(k * tk, tk), tk), :]
    else:
        xw1 = xw1_ref[...]
    acc_ref[...] += jnp.dot(a_ref[...], xw1, preferred_element_type=jnp.float32)

    @pl.when(k == pl.num_programs(1) - 1)
    def _():
        h = jnp.maximum(acc_ref[...] + b1_ref[...], 0.0)
        p_ref[...] = jnp.dot(h, w2_ref[...],
                             preferred_element_type=jnp.float32).astype(p_ref.dtype)


def _layer2_kernel(a_ref, p_ref, b2_ref, out_ref, acc_ref, *, tk, resident, opo):
    """out = row_softmax(A @ P + b2), padded feature lanes masked out."""
    k = pl.program_id(1)

    @pl.when(k == 0)
    def _():
        acc_ref[...] = jnp.zeros_like(acc_ref)

    if resident:
        pv = p_ref[pl.ds(pl.multiple_of(k * tk, tk), tk), :]
    else:
        pv = p_ref[...]
    acc_ref[...] += jnp.dot(a_ref[...], pv, preferred_element_type=jnp.float32)

    @pl.when(k == pl.num_programs(1) - 1)
    def _():
        z = acc_ref[...] + b2_ref[...]
        col = jax.lax.broadcasted_iota(jnp.int32, z.shape, 1)
        z = jnp.where(col < opo, z, -jnp.inf)
        z = z - jnp.max(z, axis=1, keepdims=True)
        e = jnp.exp(z)
        out_ref[...] = (e / jnp.sum(e, axis=1, keepdims=True)).astype(out_ref.dtype)


# --------------------------------------------------------------------------- #
# wrapper
# --------------------------------------------------------------------------- #
@functools.partial(jax.jit, static_argnames=("force_tiled", "tm", "tk"))
def gcn_forward(admat, features, w1, b1, w2, b2, *, force_tiled=False, tm=512, tk=512):
    n, _ = features.shape
    opi = w1.shape[1]
    opo = w2.shape[1]

    op1 = _round_up(opi, LANE)   # padded hidden width (lane-dense)
    op2 = _round_up(opo, LANE)   # padded output width (lane-dense stores)

    f32 = jnp.float32
    b1v = jnp.reshape(b1.astype(f32), (1, -1))
    b2v = jnp.reshape(b2.astype(f32), (1, -1))

    # X @ W1 is tiny (N x 128 x 128 after padding) -- fold it outside the kernel
    # so the heavy reduction only touches A and XW1.
    xw1 = features.astype(f32) @ w1.astype(f32)                      # (n, opi)

    use_fused = (not force_tiled) and (_round_up(n, LANE) <= FUSE_MAX_NPAD)

    if use_fused:
        npad = _round_up(n, LANE)
        a_p = jnp.pad(admat.astype(f32), ((0, npad - n), (0, npad - n)))
        xw1_p = jnp.pad(xw1, ((0, npad - n), (0, op1 - opi)))
        b1_p = jnp.pad(b1v, ((0, 0), (0, op1 - opi)))
        w2_p = jnp.pad(w2.astype(f32), ((0, op1 - opi), (0, op2 - opo)))
        b2_p = jnp.pad(b2v, ((0, 0), (0, op2 - opo)))

        out_p = pl.pallas_call(
            functools.partial(_fused_kernel, opo=opo),
            out_shape=jax.ShapeDtypeStruct((npad, op2), f32),
            in_specs=[pl.BlockSpec(memory_space=pltpu.MemorySpace.VMEM)] * 5,
            out_specs=pl.BlockSpec(memory_space=pltpu.MemorySpace.VMEM),
            compiler_params=pltpu.CompilerParams(vmem_limit_bytes=32 << 20),
        )(a_p, xw1_p, b1_p, w2_p, b2_p)
        return out_p[:n, :opo]

    # ------------------------- tiled large-graph path ------------------------ #
    npad = _round_up(n, math.lcm(tm, tk))
    bf16 = jnp.bfloat16

    # bf16 for the big streamed operands; zero padding stays exactly zero in bf16,
    # which preserves the "A's zero columns annihilate padded P rows" invariant.
    a_p = jnp.pad(admat.astype(f32), ((0, npad - n), (0, npad - n))).astype(bf16)
    xw1_p = jnp.pad(xw1, ((0, npad - n), (0, op1 - opi))).astype(bf16)
    b1_p = jnp.pad(b1v, ((0, 0), (0, op1 - opi)))
    w2_p = jnp.pad(w2.astype(f32), ((0, op1 - opi), (0, op2 - opo)))
    b2_p = jnp.pad(b2v, ((0, 0), (0, op2 - opo)))

    grid = (npad // tm, npad // tk)
    resident = npad * op1 * 2 <= RESIDENT_MAX_BYTES   # bf16 bytes of XW1 / P
    cparams = pltpu.CompilerParams(
        dimension_semantics=("parallel", "arbitrary"),
        vmem_limit_bytes=(40 << 20) if resident else (32 << 20),
    )

    if resident:
        # whole narrow operand lives in VMEM: A is the only large HBM stream
        xw1_spec = pl.BlockSpec((npad, op1), lambda i, k: (0, 0))
        p_in_spec = pl.BlockSpec((npad, op2), lambda i, k: (0, 0))
    else:
        xw1_spec = pl.BlockSpec((tk, op1), lambda i, k: (k, 0))
        p_in_spec = pl.BlockSpec((tk, op2), lambda i, k: (k, 0))

    # ---- layer 1: P = ReLU(A @ XW1 + b1) @ W2  (bf16 handoff to layer 2) ----
    p = pl.pallas_call(
        functools.partial(_layer1_kernel, tk=tk, resident=resident),
        out_shape=jax.ShapeDtypeStruct((npad, op2), bf16),
        grid_spec=pltpu.PrefetchScalarGridSpec(
            num_scalar_prefetch=0,
            grid=grid,
            in_specs=[
                pl.BlockSpec((tm, tk), lambda i, k: (i, k)),     # A tile (bf16 stream)
                xw1_spec,                                        # XW1 (resident/stream)
                pl.BlockSpec((1, op1), lambda i, k: (0, 0)),     # b1
                pl.BlockSpec((op1, op2), lambda i, k: (0, 0)),   # W2 (resident)
            ],
            out_specs=pl.BlockSpec((tm, op2), lambda i, k: (i, 0)),
            scratch_shapes=[pltpu.VMEM((tm, op1), f32)],
        ),
        compiler_params=cparams,
    )(a_p, xw1_p, b1_p, w2_p)

    # ---- layer 2 + row softmax: softmax(A @ P + b2) -------------------------
    out_p = pl.pallas_call(
        functools.partial(_layer2_kernel, tk=tk, resident=resident, opo=opo),
        out_shape=jax.ShapeDtypeStruct((npad, op2), f32),
        grid_spec=pltpu.PrefetchScalarGridSpec(
            num_scalar_prefetch=0,
            grid=grid,
            in_specs=[
                pl.BlockSpec((tm, tk), lambda i, k: (i, k)),     # A tile
                p_in_spec,                                       # P (resident/stream)
                pl.BlockSpec((1, op2), lambda i, k: (0, 0)),     # b2
            ],
            out_specs=pl.BlockSpec((tm, op2), lambda i, k: (i, 0)),
            scratch_shapes=[pltpu.VMEM((tm, op2), f32)],
        ),
        compiler_params=cparams,
    )(a_p, p, b2_p)

    return out_p[:n, :opo]


def gcn_reference(admat, features, w1, b1, w2, b2):
    h = jnp.maximum(admat @ (features @ w1) + b1, 0.0)
    z = admat @ (h @ w2) + b2
    return jax.nn.softmax(z, axis=1)


if __name__ == "__main__":
    # module-consistent small sizes: ipi=16 input feats, opi=32 hidden, opo=8 out
    N, ipi, opi, opo = 8, 16, 32, 8

    key = jax.random.PRNGKey(0)
    k_adj, k_x, k_w1, k_b1, k_w2, k_b2 = jax.random.split(key, 6)

    admat = jax.random.uniform(k_adj, (N, N), dtype=jnp.float32)
    admat = 0.5 * (admat + admat.T)
    admat = admat / jnp.sum(admat, axis=1, keepdims=True)

    features = jax.random.normal(k_x, (N, ipi), dtype=jnp.float32)
    w1 = jax.random.normal(k_w1, (ipi, opi), dtype=jnp.float32) / jnp.sqrt(ipi)
    b1 = jax.random.normal(k_b1, (1, opi), dtype=jnp.float32) * 0.01
    w2 = jax.random.normal(k_w2, (opi, opo), dtype=jnp.float32) / jnp.sqrt(opi)
    b2 = jax.random.normal(k_b2, (1, opo), dtype=jnp.float32) * 0.01

    ref = gcn_reference(admat, features, w1, b1, w2, b2)

    # fused single-kernel path (the path the module's real sizes hit): f32, exact divide
    out_fused = jax.block_until_ready(gcn_forward(admat, features, w1, b1, w2, b2))
    assert out_fused.shape == (N, opo)
    assert jnp.allclose(out_fused, ref, atol=1e-5, rtol=1e-5), "fused path mismatch"
    assert jnp.allclose(jnp.sum(out_fused, axis=1), 1.0, atol=1e-5)

    # tiled large-graph path (bf16 A / XW1 / P with f32 accumulation), forced here
    # at small N just to exercise the code path; tolerance reflects bf16 inputs.
    out_tiled = jax.block_until_ready(
        gcn_forward(admat, features, w1, b1, w2, b2, force_tiled=True))
    assert out_tiled.shape == (N, opo)
    assert jnp.allclose(out_tiled, ref, atol=3e-2, rtol=3e-2), "tiled path mismatch"
    assert jnp.allclose(jnp.sum(out_tiled, axis=1), 1.0, atol=1e-5)

    print("KERNEL_OK")
</pallas_src>

<mosaic_0001>
module attributes {stable_mosaic.version = 11 : i64} {
  func.func @_fused_kernel(%arg0: memref<128x128xf32, #tpu.memory_space<vmem>>, %arg1: memref<128x128xf32, #tpu.memory_space<vmem>>, %arg2: memref<1x128xf32, #tpu.memory_space<vmem>>, %arg3: memref<128x128xf32, #tpu.memory_space<vmem>>, %arg4: memref<1x128xf32, #tpu.memory_space<vmem>>, %arg5: memref<128x128xf32, #tpu.memory_space<vmem>>) attributes {dimension_semantics = [], scalar_prefetch = 0 : i64, scratch_operands = 0 : i64, tpu.core_type = #tpu.core_type<tc>} {
    %c0 = arith.constant 0 : index
    %c0_0 = arith.constant 0 : index
    %0 = vector.load %arg0[%c0, %c0_0] : memref<128x128xf32, #tpu.memory_space<vmem>>, vector<128x128xf32>
    %c0_1 = arith.constant 0 : index
    %c0_2 = arith.constant 0 : index
    %1 = vector.load %arg1[%c0_1, %c0_2] : memref<128x128xf32, #tpu.memory_space<vmem>>, vector<128x128xf32>
    %cst = arith.constant dense<0.000000e+00> : vector<128x128xf32>
    %2 = tpu.matmul %0, %1, %cst {dimension_numbers = #tpu.dot_dimension_numbers<[1], [0], [0], [1], [0, 0, 1, 1], [], []>} : vector<128x128xf32>, vector<128x128xf32>, vector<128x128xf32> -> vector<128x128xf32>
    %c0_3 = arith.constant 0 : index
    %c0_4 = arith.constant 0 : index
    %3 = vector.load %arg2[%c0_3, %c0_4] : memref<1x128xf32, #tpu.memory_space<vmem>>, vector<1x128xf32>
    %4 = vector.broadcast %3 : vector<1x128xf32> to vector<128x128xf32>
    %5 = arith.addf %2, %4 : vector<128x128xf32>
    %cst_5 = arith.constant 0.000000e+00 : f32
    %6 = vector.broadcast %cst_5 : f32 to vector<128x128xf32>
    %7 = arith.maximumf %5, %6 : vector<128x128xf32>
    %c0_6 = arith.constant 0 : index
    %c0_7 = arith.constant 0 : index
    %8 = vector.load %arg3[%c0_6, %c0_7] : memref<128x128xf32, #tpu.memory_space<vmem>>, vector<128x128xf32>
    %cst_8 = arith.constant dense<0.000000e+00> : vector<128x128xf32>
    %9 = tpu.matmul %7, %8, %cst_8 {dimension_numbers = #tpu.dot_dimension_numbers<[1], [0], [0], [1], [0, 0, 1, 1], [], []>} : vector<128x128xf32>, vector<128x128xf32>, vector<128x128xf32> -> vector<128x128xf32>
    %cst_9 = arith.constant dense<0.000000e+00> : vector<128x128xf32>
    %10 = tpu.matmul %0, %9, %cst_9 {dimension_numbers = #tpu.dot_dimension_numbers<[1], [0], [0], [1], [0, 0, 1, 1], [], []>} : vector<128x128xf32>, vector<128x128xf32>, vector<128x128xf32> -> vector<128x128xf32>
    %c0_10 = arith.constant 0 : index
    %c0_11 = arith.constant 0 : index
    %11 = vector.load %arg4[%c0_10, %c0_11] : memref<1x128xf32, #tpu.memory_space<vmem>>, vector<1x128xf32>
    %12 = vector.broadcast %11 : vector<1x128xf32> to vector<128x128xf32>
    %13 = arith.addf %10, %12 : vector<128x128xf32>
    %14 = tpu.iota {dimensions = array<i32: 1>} : vector<128x128xi32>
    %c8_i32 = arith.constant 8 : i32
    %15 = vector.broadcast %c8_i32 : i32 to vector<128x128xi32>
    %16 = arith.cmpi slt, %14, %15 : vector<128x128xi32>
    %cst_12 = arith.constant 0xFF800000 : f32
    %17 = vector.broadcast %cst_12 : f32 to vector<128x128xf32>
    %18 = arith.select %16, %13, %17 : vector<128x128xi1>, vector<128x128xf32>
    %cst_13 = arith.constant dense<0xFF800000> : vector<128xf32>
    %19 = vector.multi_reduction <maximumf>, %18, %cst_13 [1] : vector<128x128xf32> to vector<128xf32>
    %20 = vector.shape_cast %19 : vector<128xf32> to vector<128x1xf32>
    %21 = vector.broadcast %20 : vector<128x1xf32> to vector<128x128xf32>
    %22 = arith.subf %18, %21 : vector<128x128xf32>
    %23 = math.exp %22 : vector<128x128xf32>
    %cst_14 = arith.constant dense<0.000000e+00> : vector<128xf32>
    %24 = vector.multi_reduction <add>, %23, %cst_14 [1] : vector<128x128xf32> to vector<128xf32>
    %25 = vector.shape_cast %24 : vector<128xf32> to vector<128x1xf32>
    %26 = vector.broadcast %25 : vector<128x1xf32> to vector<128x128xf32>
    %27 = arith.divf %23, %26 : vector<128x128xf32>
    %c0_15 = arith.constant 0 : index
    %c0_16 = arith.constant 0 : index
    %28 = vector.load %arg5[%c0_15, %c0_16] : memref<128x128xf32, #tpu.memory_space<vmem>>, vector<128x128xf32>
    tpu.vector_store %arg5[%c0_15, %c0_16], %27 {strides = array<i32>} : memref<128x128xf32, #tpu.memory_space<vmem>>, vector<128x128xf32>,
    return
  }
}

</mosaic_0001>

<bundles_post_ra>
// kernel: gcn_forward.1
= control target key start
LH: loop header
LB: loop body
LE: loop exit
PB: predicated region body
PF: predicated region fallthrough
CT: control target
= control target key end

     0   :  { %s1272_s1 = inlined_call_operand.vmem [shape: f32[128,128], index: 1, kind: input, shape index: {}]   ;;  %s1273_s2 = inlined_call_operand.vmem [shape: f32[1,128], index: 2, kind: input, shape index: {}]   ;;  %s1274_s0 = inlined_call_operand.vmem [shape: f32[128,128], index: 0, kind: input, shape index: {}]   ;;  %s1275_s3 = inlined_call_operand.vmem [shape: f32[128,128], index: 3, kind: input, shape index: {}]   ;;  %s1276_s4 = inlined_call_operand.vmem [shape: f32[1,128], index: 4, kind: input, shape index: {}]   ;;  %s1277_s5 = inlined_call_operand.vmem [shape: f32[128,128], index: 5, kind: output, shape index: {}]  }
   0x1   :  { %v51_v0 = vld [vmem:[%s1272_s1 + $0x78] sm:$0xff]  ;;  %v50_v1 = vld [vmem:[%s1272_s1 + $0x70] sm:$0xff]  ;;  %v49_v2 = vld [vmem:[%s1272_s1 + $0x68] sm:$0xff] }
   0x2   :  { %56 = vmatpush.msra.mxu0 %v51_v0  ;;  %678 = vmatpush.msra.mxu3 %v51_v0  ;;  %v48_v3 = vld [vmem:[%s1272_s1 + $0x60] sm:$0xff]  ;;  %v47_v4 = vld [vmem:[%s1272_s1 + $0x58] sm:$0xff]  ;;  %v46_v5 = vld [vmem:[%s1272_s1 + $0x50] sm:$0xff] }
   0x3   :  { %v45_v6 = vld [vmem:[%s1272_s1 + $0x48] sm:$0xff]  ;;  %v44_v7 = vld [vmem:[%s1272_s1 + $0x40] sm:$0xff]  ;;  %v43_v8 = vld [vmem:[%s1272_s1 + $0x38] sm:$0xff] }
   0x4   :  { %57 = vmatpush.msra.mxu0 %v50_v1  ;;  %679 = vmatpush.msra.mxu3 %v50_v1  ;;  %v42_v9 = vld [vmem:[%s1272_s1 + $0x30] sm:$0xff]  ;;  %v41_v10 = vld [vmem:[%s1272_s1 + $0x28] sm:$0xff]  ;;  %v40_v11 = vld [vmem:[%s1272_s1 + $0x20] sm:$0xff] }
   0x5   :  { %v39_v12 = vld [vmem:[%s1272_s1 + $0x18] sm:$0xff]  ;;  %v38_v13 = vld [vmem:[%s1272_s1 + $0x10] sm:$0xff]  ;;  %v37_v14 = vld [vmem:[%s1272_s1 + $0x8] sm:$0xff] }
   0x6   :  { %58 = vmatpush.msra.mxu0 %v49_v2  ;;  %680 = vmatpush.msra.mxu3 %v49_v2  ;;  %v36_v15 = vld [vmem:[%s1272_s1] sm:$0xff]  ;;  %v885_v18 = vld [vmem:[%s1274_s0 + $0x8] sm:$0xff]  ;;  %v897_v20 = vld [vmem:[%s1274_s0 + $0x10] sm:$0xff] }
   0x7   :  { %v873_v16 = vld [vmem:[%s1274_s0] sm:$0xff]  ;;  %v890_v19 = vld [vmem:[%s1274_s0 + $0x68] sm:$0xff]  ;;  %v902_v21 = vld [vmem:[%s1274_s0 + $0x70] sm:$0xff] }
   0x8   :  { %59 = vmatpush.msra.mxu0 %v48_v3  ;;  %681 = vmatpush.msra.mxu3 %v48_v3  ;;  %v878_v17 = vld [vmem:[%s1274_s0 + $0x60] sm:$0xff]  ;;  %v909_v22 = vld [vmem:[%s1274_s0 + $0x18] sm:$0xff]  ;;  %v927_v25 = vld [vmem:[%s1274_s0 + $0x28] sm:$0xff] }
   0x9   :  { %v914_v23 = vld [vmem:[%s1274_s0 + $0x78] sm:$0xff]  ;;  %v921_v24 = vld [vmem:[%s1274_s0 + $0x20] sm:$0xff]  ;;  %v933_v26 = vld [vmem:[%s1274_s0 + $0x30] sm:$0xff] }
   0xa   :  { %60 = vmatpush.msra.mxu0 %v47_v4  ;;  %682 = vmatpush.msra.mxu3 %v47_v4  ;;  %v939_v27 = vld [vmem:[%s1274_s0 + $0x38] sm:$0xff]  ;;  %v151_v29 = vld [vmem:[%s1275_s3 + $0x70] sm:$0xff]  ;;  %v150_v30 = vld [vmem:[%s1275_s3 + $0x68] sm:$0xff] }
   0xb   :  { %v152_v28 = vld [vmem:[%s1275_s3 + $0x78] sm:$0xff]  ;;  %v149_v31 = vld [vmem:[%s1275_s3 + $0x60] sm:$0xff]  ;;  %v147_v34 = vld [vmem:[%s1275_s3 + $0x50] sm:$0xff] }
   0xc   :  { %61 = vmatpush.msra.mxu0 %v46_v5  ;;  %683 = vmatpush.msra.mxu3 %v46_v5  ;;  %v957_v32 = vld [vmem:[%s1274_s0 + $0x40] sm:$0xff]  ;;  %v148_v33 = vld [vmem:[%s1275_s3 + $0x58] sm:$0xff]  ;;  %v146_v35 = vld [vmem:[%s1275_s3 + $0x48] sm:$0xff] }
   0xd   :  { %153 = vmatpush.msra.mxu1 %v152_v28  ;;  %v145_v36 = vld [vmem:[%s1275_s3 + $0x40] sm:$0xff]  ;;  %v975_v37 = vld [vmem:[%s1274_s0 + $0x48] sm:$0xff]  ;;  %v144_v38 = vld [vmem:[%s1275_s3 + $0x38] sm:$0xff] }
   0xe   :  { %62 = vmatpush.msra.mxu0 %v45_v6  ;;  %684 = vmatpush.msra.mxu3 %v45_v6  ;;  %v143_v39 = vld [vmem:[%s1275_s3 + $0x30] sm:$0xff]  ;;  %v142_v40 = vld [vmem:[%s1275_s3 + $0x28] sm:$0xff]  ;;  %v141_v41 = vld [vmem:[%s1275_s3 + $0x20] sm:$0xff] }
   0xf   :  { %154 = vmatpush.msra.mxu1 %v151_v29  ;;  %v993_v42 = vld [vmem:[%s1274_s0 + $0x50] sm:$0xff]  ;;  %v140_v43 = vld [vmem:[%s1275_s3 + $0x18] sm:$0xff]  ;;  %v138_v46 = vld [vmem:[%s1275_s3 + $0x8] sm:$0xff] }
  0x10   :  { %63 = vmatpush.msra.mxu0 %v44_v7  ;;  %685 = vmatpush.msra.mxu3 %v44_v7  ;;  %v1002_v44 = vld [vmem:[%s1274_s0 + $0x58] sm:$0xff]  ;;  %v139_v45 = vld [vmem:[%s1275_s3 + $0x10] sm:$0xff]  ;;  %v137_v47 = vld [vmem:[%s1275_s3] sm:$0xff] }
  0x11   :  { %155 = vmatpush.msra.mxu1 %v150_v30  ;;  %v726_v48 = vld [vmem:[%s1273_s2] ss:$0 sm:$0xff] }
  0x12   :  { %64 = vmatpush.msra.mxu0 %v43_v8  ;;  %686 = vmatpush.msra.mxu3 %v43_v8 }
  0x13   :  { %156 = vmatpush.msra.mxu1 %v149_v31 }
  0x14   :  { %65 = vmatpush.msra.mxu0 %v42_v9  ;;  %687 = vmatpush.msra.mxu3 %v42_v9 }
  0x15   :  { %157 = vmatpush.msra.mxu1 %v148_v33 }
  0x16   :  { %66 = vmatpush.msra.mxu0 %v41_v10  ;;  %688 = vmatpush.msra.mxu3 %v41_v10 }
  0x17   :  { %158 = vmatpush.msra.mxu1 %v147_v34 }
  0x18   :  { %67 = vmatpush.msra.mxu0 %v40_v11  ;;  %689 = vmatpush.msra.mxu3 %v40_v11 }
  0x19   :  { %159 = vmatpush.msra.mxu1 %v146_v35 }
  0x1a   :  { %68 = vmatpush.msra.mxu0 %v39_v12  ;;  %690 = vmatpush.msra.mxu3 %v39_v12 }
  0x1b   :  { %160 = vmatpush.msra.mxu1 %v145_v36 }
  0x1c   :  { %69 = vmatpush.msra.mxu0 %v38_v13  ;;  %691 = vmatpush.msra.mxu3 %v38_v13 }
  0x1d   :  { %161 = vmatpush.msra.mxu1 %v144_v38 }
  0x1e   :  { %70 = vmatpush.msra.mxu0 %v37_v14  ;;  %692 = vmatpush.msra.mxu3 %v37_v14 }
  0x1f   :  { %162 = vmatpush.msra.mxu1 %v143_v39 }
  0x20   :  { %71 = vmatpush.msra.mxu0 %v36_v15  ;;  %693 = vmatpush.msra.mxu3 %v36_v15 }
  0x21   :  { %72 = vmatmul.f32.vlgmr.msra.gmra.mxu0 %v873_v16  ;;  %108 = vmatmul.f32.vlgmr.msra.gmra.mxu3 %v878_v17 }
  0x22   :  { %694 = vmatpush.msrb.mxu3 %v152_v28  ;;  %163 = vmatpush.msra.mxu1 %v142_v40 }
  0x24   :  { %695 = vmatpush.msrb.mxu3 %v151_v29  ;;  %164 = vmatpush.msra.mxu1 %v141_v41 }
  0x26   :  { %696 = vmatpush.msrb.mxu3 %v150_v30  ;;  %165 = vmatpush.msra.mxu1 %v140_v43 }
  0x28   :  { %697 = vmatpush.msrb.mxu3 %v149_v31  ;;  %166 = vmatpush.msra.mxu1 %v139_v45 }
  0x29   :  { %75 = vmatmul.f32.gmra.mxu0 %v885_v18  ;;  %111 = vmatmul.f32.gmra.mxu3 %v890_v19 }
  0x2a   :  { %698 = vmatpush.msrb.mxu3 %v148_v33  ;;  %167 = vmatpush.msra.mxu1 %v138_v46 }
  0x2c   :  { %699 = vmatpush.msrb.mxu3 %v147_v34  ;;  %168 = vmatpush.msra.mxu1 %v137_v47 }
  0x2e   :  { %700 = vmatpush.msrb.mxu3 %v146_v35 }
  0x30   :  { %701 = vmatpush.msrb.mxu3 %v145_v36 }
  0x31   :  { %78 = vmatmul.f32.gmra.mxu0 %v897_v20  ;;  %114 = vmatmul.f32.gmra.mxu3 %v902_v21 }
  0x32   :  { %702 = vmatpush.msrb.mxu3 %v144_v38 }
  0x34   :  { %703 = vmatpush.msrb.mxu3 %v143_v39 }
  0x36   :  { %704 = vmatpush.msrb.mxu3 %v142_v40 }
  0x38   :  { %705 = vmatpush.msrb.mxu3 %v141_v41 }
  0x39   :  { %81 = vmatmul.f32.gmra.mxu0 %v909_v22  ;;  %117 = vmatmul.f32.gmra.mxu3 %v914_v23 }
  0x3a   :  { %706 = vmatpush.msrb.mxu3 %v140_v43 }
  0x3c   :  { %707 = vmatpush.msrb.mxu3 %v139_v45 }
  0x3e   :  { %708 = vmatpush.msrb.mxu3 %v138_v46 }
  0x40   :  { %709 = vmatpush.msrb.mxu3 %v137_v47 }
  0x41   :  { %84 = vmatmul.f32.gmra.mxu0 %v921_v24 }
  0x49   :  { %87 = vmatmul.f32.gmra.mxu0 %v927_v25 }
  0x51   :  { %90 = vmatmul.f32.gmra.mxu0 %v933_v26 }
  0x59   :  { %93 = vmatmul.f32.gmra.mxu0 %v939_v27 }
  0x61   :  { %96 = vmatmul.f32.gmra.mxu0 %v957_v32 }
  0x69   :  { %99 = vmatmul.f32.gmra.mxu0 %v975_v37 }
  0x71   :  { %102 = vmatmul.f32.gmra.mxu0 %v993_v42 }
  0x79   :  { %105 = vmatmul.f32.gmra.mxu0 %v1002_v44 }
  0x9e   :  { %v73_v49 = vpop.f32.mrf.mxu0 }
  0x9f   :  { %v74_v50 = vadd.f32 %v726_v48, %v73_v49 }
  0xa1   :  { %v121_v51 = vmax.f32 %v74_v50, 0.0 }
  0xa3   :  { %169 = vmatmul.f32.vlgmr.msra.gmra.mxu1 %v121_v51 }
  0xa4   :  { %v109_v52 = vpop.f32.mrf.mxu3 }
  0xa5   :  { %v110_v53 = vadd.f32 %v726_v48, %v109_v52 }
  0xa6   :  { %v76_v54 = vpop.f32.mrf.mxu0 }
  0xa7   :  { %v77_v55 = vadd.f32 %v726_v48, %v76_v54  ;;  %v133_v56 = vmax.f32 %v110_v53, 0.0 }
  0xa9   :  { %v122_v57 = vmax.f32 %v77_v55, 0.0  ;;  %205 = vmatmul.f32.vlgmr.msrb.gmra.mxu3 %v133_v56 }
  0xab   :  { %172 = vmatmul.f32.gmra.mxu1 %v122_v57 }
  0xac   :  { %v112_v58 = vpop.f32.mrf.mxu3 }
  0xad   :  { %v113_v59 = vadd.f32 %v726_v48, %v112_v58 }
  0xae   :  { %v79_v60 = vpop.f32.mrf.mxu0 }
  0xaf   :  { %v80_v61 = vadd.f32 %v726_v48, %v79_v60  ;;  %v134_v62 = vmax.f32 %v113_v59, 0.0 }
  0xb1   :  { %v123_v63 = vmax.f32 %v80_v61, 0.0  ;;  %208 = vmatmul.f32.gmra.mxu3 %v134_v62 }
  0xb3   :  { %175 = vmatmul.f32.gmra.mxu1 %v123_v63 }
  0xb4   :  { %v115_v0 = vpop.f32.mrf.mxu3 }
  0xb5   :  { %v116_v1 = vadd.f32 %v726_v48, %v115_v0 }
  0xb6   :  { %v82_v2 = vpop.f32.mrf.mxu0 }
  0xb7   :  { %v83_v3 = vadd.f32 %v726_v48, %v82_v2  ;;  %v135_v4 = vmax.f32 %v116_v1, 0.0 }
  0xb9   :  { %v124_v5 = vmax.f32 %v83_v3, 0.0  ;;  %211 = vmatmul.f32.gmra.mxu3 %v135_v4 }
  0xbb   :  { %178 = vmatmul.f32.gmra.mxu1 %v124_v5 }
  0xbc   :  { %v118_v6 = vpop.f32.mrf.mxu3 }
  0xbd   :  { %v119_v7 = vadd.f32 %v726_v48, %v118_v6 }
  0xbe   :  { %v85_v8 = vpop.f32.mrf.mxu0 }
  0xbf   :  { %v86_v9 = vadd.f32 %v726_v48, %v85_v8  ;;  %v136_v10 = vmax.f32 %v119_v7, 0.0 }
  0xc1   :  { %v125_v11 = vmax.f32 %v86_v9, 0.0  ;;  %214 = vmatmul.f32.gmra.mxu3 %v136_v10 }
  0xc3   :  { %181 = vmatmul.f32.gmra.mxu1 %v125_v11 }
  0xc6   :  { %v88_v12 = vpop.f32.mrf.mxu0 }
  0xc7   :  { %v89_v13 = vadd.f32 %v726_v48, %v88_v12 }
  0xc9   :  { %v126_v14 = vmax.f32 %v89_v13, 0.0 }
  0xcb   :  { %184 = vmatmul.f32.gmra.mxu1 %v126_v14 }
  0xce   :  { %v91_v15 = vpop.f32.mrf.mxu0 }
  0xcf   :  { %v92_v28 = vadd.f32 %v726_v48, %v91_v15 }
  0xd1   :  { %v127_v29 = vmax.f32 %v92_v28, 0.0 }
  0xd3   :  { %187 = vmatmul.f32.gmra.mxu1 %v127_v29 }
  0xd6   :  { %v94_v30 = vpop.f32.mrf.mxu0 }
  0xd7   :  { %v95_v31 = vadd.f32 %v726_v48, %v94_v30 }
  0xd9   :  { %v128_v33 = vmax.f32 %v95_v31, 0.0 }
  0xdb   :  { %190 = vmatmul.f32.gmra.mxu1 %v128_v33 }
  0xde   :  { %v97_v34 = vpop.f32.mrf.mxu0 }
  0xdf   :  { %v98_v35 = vadd.f32 %v726_v48, %v97_v34 }
  0xe1   :  { %v129_v36 = vmax.f32 %v98_v35, 0.0 }
  0xe3   :  { %193 = vmatmul.f32.gmra.mxu1 %v129_v36 }
  0xe6   :  { %v100_v38 = vpop.f32.mrf.mxu0 }
  0xe7   :  { %v101_v39 = vadd.f32 %v726_v48, %v100_v38 }
  0xe9   :  { %v130_v40 = vmax.f32 %v101_v39, 0.0 }
  0xeb   :  { %196 = vmatmul.f32.gmra.mxu1 %v130_v40 }
  0xee   :  { %v103_v41 = vpop.f32.mrf.mxu0 }
  0xef   :  { %v104_v43 = vadd.f32 %v726_v48, %v103_v41 }
  0xf1   :  { %v131_v45 = vmax.f32 %v104_v43, 0.0 }
  0xf3   :  { %199 = vmatmul.f32.gmra.mxu1 %v131_v45 }
  0xf6   :  { %v106_v46 = vpop.f32.mrf.mxu0 }
  0xf7   :  { %v107_v47 = vadd.f32 %v726_v48, %v106_v46 }
  0xf9   :  { %v132_v49 = vmax.f32 %v107_v47, 0.0 }
  0xfb   :  { %202 = vmatmul.f32.gmra.mxu1 %v132_v49 }
 0x120   :  { %v170_v50 = vpop.f32.mrf.mxu1 }
 0x128   :  { %v173_v51 = vpop.f32.mrf.mxu1 }
 0x12c   :  { %v206_v52 = vpop.f32.mrf.mxu3 }
 0x130   :  { %v176_v53 = vpop.f32.mrf.mxu1 }
 0x134   :  { %v209_v54 = vpop.f32.mrf.mxu3 }
 0x138   :  { %v179_v55 = vpop.f32.mrf.mxu1 }
 0x13c   :  { %v212_v56 = vpop.f32.mrf.mxu3 }
 0x140   :  { %v182_v57 = vpop.f32.mrf.mxu1 }
 0x144   :  { %v215_v58 = vpop.f32.mrf.mxu3 }
 0x145   :  { %222 = vmatpush.msra.mxu2 %v215_v58  ;;  %710 = vmatpush.msra.mxu3 %v215_v58 }
 0x147   :  { %223 = vmatpush.msra.mxu2 %v212_v56  ;;  %711 = vmatpush.msra.mxu3 %v212_v56 }
 0x148   :  { %v185_v59 = vpop.f32.mrf.mxu1 }
 0x149   :  { %224 = vmatpush.msra.mxu2 %v209_v54  ;;  %712 = vmatpush.msra.mxu3 %v209_v54 }
 0x14b   :  { %225 = vmatpush.msra.mxu2 %v206_v52  ;;  %713 = vmatpush.msra.mxu3 %v206_v52 }
 0x150   :  { %v188_v48 = vpop.f32.mrf.mxu1 }
 0x158   :  { %v191_v60 = vpop.f32.mrf.mxu1 }
 0x160   :  { %v194_v61 = vpop.f32.mrf.mxu1 }
 0x168   :  { %v197_v62 = vpop.f32.mrf.mxu1 }
 0x170   :  { %v200_v63 = vpop.f32.mrf.mxu1 }
 0x178   :  { %v203_v0 = vpop.f32.mrf.mxu1 }
 0x179   :  { %226 = vmatpush.msra.mxu2 %v203_v0  ;;  %714 = vmatpush.msra.mxu3 %v203_v0 }
 0x17b   :  { %227 = vmatpush.msra.mxu2 %v200_v63  ;;  %715 = vmatpush.msra.mxu3 %v200_v63 }
 0x17d   :  { %228 = vmatpush.msra.mxu2 %v197_v62  ;;  %716 = vmatpush.msra.mxu3 %v197_v62 }
 0x17f   :  { %229 = vmatpush.msra.mxu2 %v194_v61  ;;  %717 = vmatpush.msra.mxu3 %v194_v61 }
 0x181   :  { %230 = vmatpush.msra.mxu2 %v191_v60  ;;  %718 = vmatpush.msra.mxu3 %v191_v60 }
 0x183   :  { %231 = vmatpush.msra.mxu2 %v188_v48  ;;  %719 = vmatpush.msra.mxu3 %v188_v48 }
 0x185   :  { %232 = vmatpush.msra.mxu2 %v185_v59  ;;  %720 = vmatpush.msra.mxu3 %v185_v59 }
 0x187   :  { %233 = vmatpush.msra.mxu2 %v182_v57  ;;  %721 = vmatpush.msra.mxu3 %v182_v57 }
 0x189   :  { %234 = vmatpush.msra.mxu2 %v179_v55  ;;  %722 = vmatpush.msra.mxu3 %v179_v55 }
 0x18b   :  { %235 = vmatpush.msra.mxu2 %v176_v53  ;;  %723 = vmatpush.msra.mxu3 %v176_v53 }
 0x18d   :  { %236 = vmatpush.msra.mxu2 %v173_v51  ;;  %724 = vmatpush.msra.mxu3 %v173_v51 }
 0x18f   :  { %237 = vmatpush.msra.mxu2 %v170_v50  ;;  %725 = vmatpush.msra.mxu3 %v170_v50 }
 0x190   :  { %238 = vmatmul.f32.vlgmr.msra.gmra.mxu2 %v873_v16  ;;  %274 = vmatmul.f32.vlgmr.msra.gmra.mxu3 %v878_v17  ;;  %v287_v16 = vlaneseq }
 0x192   :  { %v1033_v17 = vand.u32 127, %v287_v16 }
 0x194   :  { %vm289_vm0 = vcmp.lt.s32.totalorder %v1033_v17, 8 }
 0x198   :  { %241 = vmatmul.f32.gmra.mxu2 %v885_v18  ;;  %277 = vmatmul.f32.gmra.mxu3 %v890_v19  ;;  %v1038_v18 = vld [vmem:[%s1276_s4] ss:$0 sm:$0xff] }
 0x1a0   :  { %244 = vmatmul.f32.gmra.mxu2 %v897_v20  ;;  %280 = vmatmul.f32.gmra.mxu3 %v902_v21 }
 0x1a8   :  { %247 = vmatmul.f32.gmra.mxu2 %v909_v22  ;;  %283 = vmatmul.f32.gmra.mxu3 %v914_v23 }
 0x1b0   :  { %250 = vmatmul.f32.gmra.mxu2 %v921_v24 }
 0x1b8   :  { %253 = vmatmul.f32.gmra.mxu2 %v927_v25 }
 0x1c0   :  { %256 = vmatmul.f32.gmra.mxu2 %v933_v26 }
 0x1c8   :  { %259 = vmatmul.f32.gmra.mxu2 %v939_v27 }
 0x1d0   :  { %262 = vmatmul.f32.gmra.mxu2 %v957_v32 }
 0x1d8   :  { %265 = vmatmul.f32.gmra.mxu2 %v975_v37 }
 0x1e0   :  { %268 = vmatmul.f32.gmra.mxu2 %v993_v42 }
 0x1e8   :  { %271 = vmatmul.f32.gmra.mxu2 %v1002_v44 }
 0x213   :  { %v239_v19 = vpop.f32.mrf.mxu2  ;;  %v275_v21 = vpop.f32.mrf.mxu3 }
 0x214   :  { %v240_v20 = vadd.f32 %v1038_v18, %v239_v19  ;;  %v276_v23 = vadd.f32 %v1038_v18, %v275_v21 }
 0x216   :  { %v1044_v22 = vsel %vm289_vm0, %v240_v20, -inf  ;;  %v1050_v25 = vsel %vm289_vm0, %v276_v23, -inf }
 0x217   :  { %306 = vmax.xlane.f32.xlu0 %v1044_v22 }
 0x21b   :  { %v242_v24 = vpop.f32.mrf.mxu2  ;;  %v278_v12 = vpop.f32.mrf.mxu3 }
 0x21c   :  { %v243_v26 = vadd.f32 %v1038_v18, %v242_v24  ;;  %v279_v45 = vadd.f32 %v1038_v18, %v278_v12 }
 0x21e   :  { %v1061_v42 = vsel %vm289_vm0, %v243_v26, -inf  ;;  %v1127_v50 = vsel %vm289_vm0, %v279_v45, -inf }
 0x21f   :  { %330 = vmax.xlane.f32.xlu0 %v1050_v25 }
 0x223   :  { %v245_v27 = vpop.f32.mrf.mxu2  ;;  %v281_v29 = vpop.f32.mrf.mxu3 }
 0x224   :  { %v246_v32 = vadd.f32 %v1038_v18, %v245_v27  ;;  %v282_v51 = vadd.f32 %v1038_v18, %v281_v29 }
 0x226   :  { %v1057_v37 = vsel %vm289_vm0, %v246_v32, -inf  ;;  %v1134_v52 = vsel %vm289_vm0, %v282_v51, -inf }
 0x227   :  { %310 = vmax.xlane.f32.xlu1 %v1057_v37  ;;  %308 = vmax.xlane.f32.xlu0 %v1061_v42 }
 0x22b   :  { %v248_v44 = vpop.f32.mrf.mxu2  ;;  %v284_v35 = vpop.f32.mrf.mxu3 }
 0x22c   :  { %v249_v1 = vadd.f32 %v1038_v18, %v248_v44  ;;  %v285_v38 = vadd.f32 %v1038_v18, %v284_v35 }
 0x22e   :  { %v1068_v2 = vsel %vm289_vm0, %v249_v1, -inf  ;;  %v1111_v41 = vsel %vm289_vm0, %v285_v38, -inf }
 0x22f   :  { %312 = vmax.xlane.f32.xlu1 %v1068_v2 }
 0x233   :  { %v251_v3 = vpop.f32.mrf.mxu2 }
 0x234   :  { %v252_v4 = vadd.f32 %v1038_v18, %v251_v3 }
 0x236   :  { %v1074_v5 = vsel %vm289_vm0, %v252_v4, -inf }
 0x237   :  { %314 = vmax.xlane.f32.xlu2 %v1074_v5 }
 0x23b   :  { %v254_v6 = vpop.f32.mrf.mxu2 }
 0x23c   :  { %v255_v7 = vadd.f32 %v1038_v18, %v254_v6 }
 0x23e   :  { %v1080_v8 = vsel %vm289_vm0, %v255_v7, -inf }
 0x23f   :  { %316 = vmax.xlane.f32.xlu2 %v1080_v8 }
 0x243   :  { %v257_v9 = vpop.f32.mrf.mxu2 }
 0x244   :  { %v258_v10 = vadd.f32 %v1038_v18, %v257_v9 }
 0x246   :  { %v1086_v11 = vsel %vm289_vm0, %v258_v10, -inf }
 0x247   :  { %318 = vmax.xlane.f32.xlu0 %v1086_v11 }
 0x24b   :  { %v260_v13 = vpop.f32.mrf.mxu2 }
 0x24c   :  { %v261_v14 = vadd.f32 %v1038_v18, %v260_v13 }
 0x24e   :  { %v1092_v15 = vsel %vm289_vm0, %v261_v14, -inf }
 0x24f   :  { %320 = vmax.xlane.f32.xlu1 %v1092_v15 }
 0x253   :  { %v263_v28 = vpop.f32.mrf.mxu2 }
 0x254   :  { %v264_v30 = vadd.f32 %v1038_v18, %v263_v28 }
 0x256   :  { %v1098_v31 = vsel %vm289_vm0, %v264_v30, -inf }
 0x257   :  { %322 = vmax.xlane.f32.xlu2 %v1098_v31 }
 0x25b   :  { %v266_v33 = vpop.f32.mrf.mxu2 }
 0x25c   :  { %v267_v34 = vadd.f32 %v1038_v18, %v266_v33 }
 0x25e   :  { %v1104_v36 = vsel %vm289_vm0, %v267_v34, -inf }
 0x25f   :  { %324 = vmax.xlane.f32.xlu0 %v1104_v36 }
 0x263   :  { %v269_v39 = vpop.f32.mrf.mxu2 }
 0x264   :  { %v270_v40 = vadd.f32 %v1038_v18, %v269_v39 }
 0x266   :  { %v1115_v43 = vsel %vm289_vm0, %v270_v40, -inf }
 0x267   :  { %326 = vmax.xlane.f32.xlu1 %v1115_v43  ;;  %336 = vmax.xlane.f32.xlu0 %v1111_v41 }
 0x26b   :  { %v272_v46 = vpop.f32.mrf.mxu2 }
 0x26c   :  { %v273_v47 = vadd.f32 %v1038_v18, %v272_v46 }
 0x26e   :  { %v1123_v49 = vsel %vm289_vm0, %v273_v47, -inf }
 0x26f   :  { %328 = vmax.xlane.f32.xlu2 %v1123_v49  ;;  %332 = vmax.xlane.f32.xlu1 %v1127_v50 }
 0x277   :  { %334 = vmax.xlane.f32.xlu2 %v1134_v52 }
 0x28a   :  { %v307_v53 = vpop.xlane.xlu0 %306 }
 0x28b   :  { %v338_v54 = vsub.f32 %v1044_v22, %v307_v53 }
 0x28d   :  { %v354_v55 = vmul.f32 1.442695, %v338_v54 }
 0x28f   :  { %728 = vpow2.f32 %v354_v55 }
 0x292   :  { %v331_v56 = vpop.xlane.xlu0 %330 }
 0x293   :  { %v350_v57 = vsub.f32 %v1050_v25, %v331_v56 }
 0x295   :  { %v1139_v58 = vpop.eup %728  ;;  %v378_v59 = vmul.f32 1.442695, %v350_v57 }
 0x296   :  { %386 = vadd.xlane.f32.xlu1 %v1139_v58 }
 0x297   :  { %730 = vpow2.f32 %v378_v59 }
 0x29a   :  { %v311_v48 = vpop.xlane.xlu1 %310  ;;  %v309_v60 = vpop.xlane.xlu0 %308 }
 0x29b   :  { %v340_v61 = vsub.f32 %v1057_v37, %v311_v48  ;;  %v339_v62 = vsub.f32 %v1061_v42, %v309_v60 }
 0x29d   :  { %v1144_v63 = vpop.eup %730  ;;  %v358_v0 = vmul.f32 1.442695, %v340_v61  ;;  %v356_v16 = vmul.f32 1.442695, %v339_v62 }
 0x29e   :  { %410 = vadd.xlane.f32.xlu1 %v1144_v63 }
 0x29f   :  { %732 = vpow2.f32 %v358_v0 }
 0x2a0   :  { %734 = vpow2.f32 %v356_v16 }
 0x2a2   :  { %v313_v17 = vpop.xlane.xlu1 %312 }
 0x2a3   :  { %v341_v18 = vsub.f32 %v1068_v2, %v313_v17 }
 0x2a5   :  { %v1148_v19 = vpop.eup %732  ;;  %v360_v20 = vmul.f32 1.442695, %v341_v18 }
 0x2a6   :  { %v1150_v21 = vpop.eup %734  ;;  %390 = vadd.xlane.f32.xlu0 %v1148_v19 }
 0x2a7   :  { %736 = vpow2.f32 %v360_v20  ;;  %388 = vadd.xlane.f32.xlu2 %v1150_v21 }
 0x2aa   :  { %v315_v22 = vpop.xlane.xlu2 %314 }
 0x2ab   :  { %v342_v23 = vsub.f32 %v1074_v5, %v315_v22 }
 0x2ad   :  { %v1155_v24 = vpop.eup %736  ;;  %v362_v25 = vmul.f32 1.442695, %v342_v23 }
 0x2ae   :  { %392 = vadd.xlane.f32.xlu1 %v1155_v24 }
 0x2af   :  { %738 = vpow2.f32 %v362_v25 }
 0x2b2   :  { %v317_v26 = vpop.xlane.xlu2 %316 }
 0x2b3   :  { %v343_v27 = vsub.f32 %v1080_v8, %v317_v26 }
 0x2b5   :  { %v1159_v32 = vpop.eup %738  ;;  %v364_v37 = vmul.f32 1.442695, %v343_v27 }
 0x2b6   :  { %394 = vadd.xlane.f32.xlu2 %v1159_v32 }
 0x2b7   :  { %740 = vpow2.f32 %v364_v37 }
 0x2ba   :  { %v319_v42 = vpop.xlane.xlu0 %318 }
 0x2bb   :  { %v344_v44 = vsub.f32 %v1086_v11, %v319_v42 }
 0x2bd   :  { %v1163_v1 = vpop.eup %740  ;;  %v366_v2 = vmul.f32 1.442695, %v344_v44 }
 0x2be   :  { %396 = vadd.xlane.f32.xlu0 %v1163_v1 }
 0x2bf   :  { %742 = vpow2.f32 %v366_v2 }
 0x2c2   :  { %v321_v3 = vpop.xlane.xlu1 %320 }
 0x2c3   :  { %v345_v4 = vsub.f32 %v1092_v15, %v321_v3 }
 0x2c5   :  { %v1167_v5 = vpop.eup %742  ;;  %v368_v6 = vmul.f32 1.442695, %v345_v4 }
 0x2c6   :  { %398 = vadd.xlane.f32.xlu1 %v1167_v5 }
 0x2c7   :  { %744 = vpow2.f32 %v368_v6 }
 0x2ca   :  { %v323_v7 = vpop.xlane.xlu2 %322 }
 0x2cb   :  { %v346_v8 = vsub.f32 %v1098_v31, %v323_v7 }
 0x2cd   :  { %v1171_v9 = vpop.eup %744  ;;  %v370_v10 = vmul.f32 1.442695, %v346_v8 }
 0x2ce   :  { %400 = vadd.xlane.f32.xlu2 %v1171_v9 }
 0x2cf   :  { %746 = vpow2.f32 %v370_v10 }
 0x2d2   :  { %v325_v11 = vpop.xlane.xlu0 %324 }
 0x2d3   :  { %v347_v12 = vsub.f32 %v1104_v36, %v325_v11 }
 0x2d5   :  { %v1175_v13 = vpop.eup %746  ;;  %v372_v14 = vmul.f32 1.442695, %v347_v12 }
 0x2d6   :  { %402 = vadd.xlane.f32.xlu0 %v1175_v13 }
 0x2d7   :  { %748 = vpow2.f32 %v372_v14 }
 0x2da   :  { %v327_v15 = vpop.xlane.xlu1 %326  ;;  %v337_v28 = vpop.xlane.xlu0 %336 }
 0x2db   :  { %v348_v29 = vsub.f32 %v1115_v43, %v327_v15  ;;  %v353_v30 = vsub.f32 %v1111_v41, %v337_v28 }
 0x2dd   :  { %v1180_v31 = vpop.eup %748  ;;  %v374_v33 = vmul.f32 1.442695, %v348_v29  ;;  %v384_v34 = vmul.f32 1.442695, %v353_v30 }
 0x2de   :  { %404 = vadd.xlane.f32.xlu1 %v1180_v31 }
 0x2df   :  { %750 = vpow2.f32 %v374_v33 }
 0x2e0   :  { %752 = vpow2.f32 %v384_v34 }
 0x2e2   :  { %v329_v35 = vpop.xlane.xlu2 %328  ;;  %v333_v36 = vpop.xlane.xlu1 %332 }
 0x2e3   :  { %v349_v38 = vsub.f32 %v1123_v49, %v329_v35  ;;  %v351_v39 = vsub.f32 %v1127_v50, %v333_v36 }
 0x2e5   :  { %v1185_v40 = vpop.eup %750  ;;  %v376_v45 = vmul.f32 1.442695, %v349_v38  ;;  %v380_v43 = vmul.f32 1.442695, %v351_v39 }
 0x2e6   :  { %v1187_v46 = vpop.eup %752  ;;  %406 = vadd.xlane.f32.xlu2 %v1185_v40 }
 0x2e7   :  { %754 = vpow2.f32 %v376_v45  ;;  %416 = vadd.xlane.f32.xlu1 %v1187_v46 }
 0x2e8   :  { %756 = vpow2.f32 %v380_v43 }
 0x2ea   :  { %v335_v41 = vpop.xlane.xlu2 %334 }
 0x2eb   :  { %v352_v47 = vsub.f32 %v1134_v52, %v335_v41 }
 0x2ed   :  { %v1192_v51 = vpop.eup %754  ;;  %v382_v49 = vmul.f32 1.442695, %v352_v47 }
 0x2ee   :  { %v1194_v53 = vpop.eup %756  ;;  %408 = vadd.xlane.f32.xlu0 %v1192_v51 }
 0x2ef   :  { %758 = vpow2.f32 %v382_v49  ;;  %412 = vadd.xlane.f32.xlu2 %v1194_v53 }
 0x2f5   :  { %v1198_v50 = vpop.eup %758 }
 0x2f6   :  { %414 = vadd.xlane.f32.xlu0 %v1198_v50 }
 0x309   :  { %v387_v54 = vpop.xlane.xlu1 %386 }
 0x30a   :  { %760 = vrcp.f32 %v387_v54  ;;  %v429_v59 = vand.u32 2147483648, %v387_v54  ;;  %v427_v60 = vand.u32 2147483647, %v387_v54  ;;  %vm423_vm2 = vweird.f32 %v387_v54 }
 0x30c   :  { %v430_v0 = vor.u32 1.1754944e-38, %v429_v59  ;;  %vm428_vm4 = vcmp.eq.f32.partialorder %v427_v60, 8.507059e+37 }
 0x310   :  { %v761_v55 = vpop.eup %760 }
 0x311   :  { %v419_v56 = vmul.f32 %v761_v55, %v387_v54  ;;  %v411_v57 = vpop.xlane.xlu1 %410  ;;  %vm424_vm1 = vweird.f32 %v761_v55 }
 0x312   :  { %762 = vrcp.f32 %v411_v57  ;;  %vm425_vm3 = vmor %vm423_vm2, %vm424_vm1  ;;  %v609_v26 = vand.u32 2147483648, %v411_v57  ;;  %v607_v37 = vand.u32 2147483647, %v411_v57  ;;  %vm603_vm6 = vweird.f32 %v411_v57 }
 0x313   :  { %v420_v52 = vsub.f32 1.0, %v419_v56 }
 0x314   :  { %v610_v2 = vor.u32 1.1754944e-38, %v609_v26  ;;  %vm608_vm8 = vcmp.eq.f32.partialorder %v607_v37, 8.507059e+37 }
 0x315   :  { %v421_v48 = vmul.f32 %v761_v55, %v420_v52 }
 0x317   :  { %v422_v61 = vadd.f32 %v761_v55, %v421_v48 }
 0x318   :  { %v763_v62 = vpop.eup %762 }
 0x319   :  { %v426_v16 = vsel %vm425_vm3, %v761_v55, %v422_v61  ;;  %v599_v17 = vmul.f32 %v763_v62, %v411_v57  ;;  %v391_v18 = vpop.xlane.xlu0 %390  ;;  %vm604_vm5 = vweird.f32 %v763_v62 }
 0x31a   :  { %v431_v20 = vsel %vm428_vm4, %v430_v0, %v426_v16  ;;  %v389_v22 = vpop.xlane.xlu2 %388  ;;  %764 = vrcp.f32 %v391_v18  ;;  %vm605_vm7 = vmor %vm603_vm6, %vm604_vm5  ;;  %v459_v14 = vand.u32 2147483648, %v391_v18  ;;  %v457_v29 = vand.u32 2147483647, %v391_v18 }
 0x31b   :  { %v432_v23 = vmul.f32 %v1139_v58, %v431_v20  ;;  %v600_v25 = vsub.f32 1.0, %v599_v17  ;;  %766 = vrcp.f32 %v389_v22  ;;  %v444_v15 = vand.u32 2147483648, %v389_v22 }
 0x31c   :  { %v442_v33 = vand.u32 2147483647, %v389_v22  ;;  %vm453_vm11 = vweird.f32 %v391_v18  ;;  %vm438_vm12 = vweird.f32 %v389_v22  ;;  %vm458_vm15 = vcmp.eq.f32.partialorder %v457_v29, 8.507059e+37 }
 0x31d   :  { %658 = vst [vmem:[%s1277_s5] sm:$0xff] %v432_v23  ;;  %v601_v27 = vmul.f32 %v763_v62, %v600_v25  ;;  %v445_v38 = vor.u32 1.1754944e-38, %v444_v15 }
 0x31e   :  { %vm443_vm0 = vcmp.eq.f32.partialorder %v442_v33, 8.507059e+37 }
 0x31f   :  { %v602_v42 = vadd.f32 %v763_v62, %v601_v27 }
 0x320   :  { %v765_v44 = vpop.eup %764 }
 0x321   :  { %v767_v3 = vpop.eup %766  ;;  %v606_v4 = vsel %vm605_vm7, %v763_v62, %v602_v42  ;;  %v449_v6 = vmul.f32 %v765_v44, %v391_v18  ;;  %v393_v58 = vpop.xlane.xlu1 %392  ;;  %vm454_vm9 = vweird.f32 %v765_v44 }
 0x322   :  { %v611_v7 = vsel %vm608_vm8, %v610_v2, %v606_v4  ;;  %v434_v8 = vmul.f32 %v767_v3, %v389_v22  ;;  %768 = vrcp.f32 %v393_v58  ;;  %vm439_vm10 = vweird.f32 %v767_v3  ;;  %vm455_vm13 = vmor %vm453_vm11, %vm454_vm9 }
 0x323   :  { %v612_v10 = vmul.f32 %v1144_v63, %v611_v7  ;;  %v450_v11 = vsub.f32 1.0, %v449_v6  ;;  %v460_v63 = vor.u32 1.1754944e-38, %v459_v14  ;;  %vm440_vm14 = vmor %vm438_vm12, %vm439_vm10  ;;  %v474_v57 = vand.u32 2147483648, %v393_v58 }
 0x324   :  { %v435_v12 = vsub.f32 1.0, %v434_v8  ;;  %v472_v59 = vand.u32 2147483647, %v393_v58  ;;  %vm468_vm2 = vweird.f32 %v393_v58 }
 0x325   :  { %670 = vst [vmem:[%s1277_s5 + $0x60] sm:$0xff] %v612_v10  ;;  %v451_v28 = vmul.f32 %v765_v44, %v450_v11 }
 0x326   :  { %v436_v30 = vmul.f32 %v767_v3, %v435_v12  ;;  %vm473_vm4 = vcmp.eq.f32.partialorder %v472_v59, 8.507059e+37 }
 0x327   :  { %v452_v34 = vadd.f32 %v765_v44, %v451_v28 }
 0x328   :  { %v769_v35 = vpop.eup %768  ;;  %v437_v36 = vadd.f32 %v767_v3, %v436_v30 }
 0x329   :  { %v456_v39 = vsel %vm455_vm13, %v765_v44, %v452_v34  ;;  %v464_v45 = vmul.f32 %v769_v35, %v393_v58  ;;  %v395_v43 = vpop.xlane.xlu2 %394  ;;  %vm469_vm1 = vweird.f32 %v769_v35 }
 0x32a   :  { %v441_v41 = vsel %vm440_vm14, %v767_v3, %v437_v36  ;;  %v461_v47 = vsel %vm458_vm15, %v460_v63, %v456_v39  ;;  %770 = vrcp.f32 %v395_v43  ;;  %vm470_vm3 = vmor %vm468_vm2, %vm469_vm1  ;;  %v489_v18 = vand.u32 2147483648, %v395_v43 }
 0x32b   :  { %v446_v49 = vsel %vm443_vm0, %v445_v38, %v441_v41  ;;  %v462_v54 = vmul.f32 %v1148_v19, %v461_v47  ;;  %v465_v55 = vsub.f32 1.0, %v464_v45  ;;  %v475_v19 = vor.u32 1.1754944e-38, %v474_v57 }
 0x32c   :  { %v447_v56 = vmul.f32 %v1150_v21, %v446_v49  ;;  %v487_v22 = vand.u32 2147483647, %v395_v43  ;;  %vm483_vm6 = vweird.f32 %v395_v43  ;;  %v490_v26 = vor.u32 1.1754944e-38, %v489_v18 }
 0x32d   :  { %660 = vst [vmem:[%s1277_s5 + $0x10] sm:$0xff] %v462_v54  ;;  %v466_v52 = vmul.f32 %v769_v35, %v465_v55 }
 0x32e   :  { %659 = vst [vmem:[%s1277_s5 + $0x8] sm:$0xff] %v447_v56  ;;  %vm488_vm8 = vcmp.eq.f32.partialorder %v487_v22, 8.507059e+37 }
 0x32f   :  { %v467_v48 = vadd.f32 %v769_v35, %v466_v52 }
 0x330   :  { %v771_v60 = vpop.eup %770 }
 0x331   :  { %v471_v61 = vsel %vm470_vm3, %v769_v35, %v467_v48  ;;  %v479_v21 = vmul.f32 %v771_v60, %v395_v43  ;;  %v397_v62 = vpop.xlane.xlu0 %396  ;;  %vm484_vm5 = vweird.f32 %v771_v60 }
 0x332   :  { %v476_v0 = vsel %vm473_vm4, %v475_v19, %v471_v61  ;;  %772 = vrcp.f32 %v397_v62  ;;  %vm485_vm7 = vmor %vm483_vm6, %vm484_vm5  ;;  %v504_v3 = vand.u32 2147483648, %v397_v62  ;;  %v502_v6 = vand.u32 2147483647, %v397_v62 }
 0x333   :  { %v477_v16 = vmul.f32 %v1155_v24, %v476_v0  ;;  %v480_v17 = vsub.f32 1.0, %v479_v21  ;;  %vm498_vm10 = vweird.f32 %v397_v62 }
 0x334   :  { %v505_v8 = vor.u32 1.1754944e-38, %v504_v3  ;;  %vm503_vm12 = vcmp.eq.f32.partialorder %v502_v6, 8.507059e+37 }
 0x335   :  { %661 = vst [vmem:[%s1277_s5 + $0x18] sm:$0xff] %v477_v16  ;;  %v481_v20 = vmul.f32 %v771_v60, %v480_v17 }
 0x337   :  { %v482_v23 = vadd.f32 %v771_v60, %v481_v20 }
 0x338   :  { %v773_v25 = vpop.eup %772 }
 0x339   :  { %v486_v27 = vsel %vm485_vm7, %v771_v60, %v482_v23  ;;  %v494_v37 = vmul.f32 %v773_v25, %v397_v62  ;;  %v399_v42 = vpop.xlane.xlu1 %398  ;;  %vm499_vm9 = vweird.f32 %v773_v25 }
 0x33a   :  { %v491_v44 = vsel %vm488_vm8, %v490_v26, %v486_v27  ;;  %774 = vrcp.f32 %v399_v42  ;;  %vm500_vm11 = vmor %vm498_vm10, %vm499_vm9  ;;  %v519_v28 = vand.u32 2147483648, %v399_v42  ;;  %v517_v30 = vand.u32 2147483647, %v399_v42 }
 0x33b   :  { %v492_v24 = vmul.f32 %v1159_v32, %v491_v44  ;;  %v495_v2 = vsub.f32 1.0, %v494_v37  ;;  %vm513_vm14 = vweird.f32 %v399_v42 }
 0x33c   :  { %v520_v35 = vor.u32 1.1754944e-38, %v519_v28  ;;  %vm518_vm0 = vcmp.eq.f32.partialorder %v517_v30, 8.507059e+37 }
 0x33d   :  { %662 = vst [vmem:[%s1277_s5 + $0x20] sm:$0xff] %v492_v24  ;;  %v496_v4 = vmul.f32 %v773_v25, %v495_v2 }
 0x33f   :  { %v497_v58 = vadd.f32 %v773_v25, %v496_v4 }
 0x340   :  { %v775_v7 = vpop.eup %774 }
 0x341   :  { %v501_v10 = vsel %vm500_vm11, %v773_v25, %v497_v58  ;;  %v509_v11 = vmul.f32 %v775_v7, %v399_v42  ;;  %v401_v12 = vpop.xlane.xlu2 %400  ;;  %vm514_vm13 = vweird.f32 %v775_v7 }
 0x342   :  { %v506_v14 = vsel %vm503_vm12, %v505_v8, %v501_v10  ;;  %776 = vrcp.f32 %v401_v12  ;;  %vm515_vm15 = vmor %vm513_vm14, %vm514_vm13  ;;  %v534_v43 = vand.u32 2147483648, %v401_v12  ;;  %v532_v47 = vand.u32 2147483647, %v401_v12 }
 0x343   :  { %v507_v32 = vmul.f32 %v1163_v1, %v506_v14  ;;  %v510_v15 = vsub.f32 1.0, %v509_v11  ;;  %vm528_vm2 = vweird.f32 %v401_v12 }
 0x344   :  { %v535_v55 = vor.u32 1.1754944e-38, %v534_v43  ;;  %vm533_vm4 = vcmp.eq.f32.partialorder %v532_v47, 8.507059e+37 }
 0x345   :  { %663 = vst [vmem:[%s1277_s5 + $0x28] sm:$0xff] %v507_v32  ;;  %v511_v29 = vmul.f32 %v775_v7, %v510_v15 }
 0x347   :  { %v512_v33 = vadd.f32 %v775_v7, %v511_v29 }
 0x348   :  { %v777_v34 = vpop.eup %776 }
 0x349   :  { %v516_v36 = vsel %vm515_vm15, %v775_v7, %v512_v33  ;;  %v524_v63 = vmul.f32 %v777_v34, %v401_v12  ;;  %v403_v38 = vpop.xlane.xlu0 %402  ;;  %vm529_vm1 = vweird.f32 %v777_v34 }
 0x34a   :  { %v521_v39 = vsel %vm518_vm0, %v520_v35, %v516_v36  ;;  %778 = vrcp.f32 %v403_v38  ;;  %vm530_vm3 = vmor %vm528_vm2, %vm529_vm1  ;;  %v549_v60 = vand.u32 2147483648, %v403_v38  ;;  %v547_v61 = vand.u32 2147483647, %v403_v38 }
 0x34b   :  { %v522_v1 = vmul.f32 %v1167_v5, %v521_v39  ;;  %v525_v45 = vsub.f32 1.0, %v524_v63  ;;  %vm543_vm6 = vweird.f32 %v403_v38 }
 0x34c   :  { %v550_v0 = vor.u32 1.1754944e-38, %v549_v60  ;;  %vm548_vm8 = vcmp.eq.f32.partialorder %v547_v61, 8.507059e+37 }
 0x34d   :  { %664 = vst [vmem:[%s1277_s5 + $0x30] sm:$0xff] %v522_v1  ;;  %v526_v41 = vmul.f32 %v777_v34, %v525_v45 }
 0x34f   :  { %v527_v49 = vadd.f32 %v777_v34, %v526_v41 }
 0x350   :  { %v779_v54 = vpop.eup %778 }
 0x351   :  { %v531_v56 = vsel %vm530_vm3, %v777_v34, %v527_v49  ;;  %v539_v57 = vmul.f32 %v779_v54, %v403_v38  ;;  %v405_v52 = vpop.xlane.xlu1 %404  ;;  %vm544_vm5 = vweird.f32 %v779_v54 }
 0x352   :  { %v536_v59 = vsel %vm533_vm4, %v535_v55, %v531_v56  ;;  %780 = vrcp.f32 %v405_v52  ;;  %vm545_vm7 = vmor %vm543_vm6, %vm544_vm5  ;;  %v564_v25 = vand.u32 2147483648, %v405_v52  ;;  %v562_v27 = vand.u32 2147483647, %v405_v52 }
 0x353   :  { %v537_v5 = vmul.f32 %v1171_v9, %v536_v59  ;;  %v540_v48 = vsub.f32 1.0, %v539_v57  ;;  %vm558_vm10 = vweird.f32 %v405_v52 }
 0x354   :  { %v565_v44 = vor.u32 1.1754944e-38, %v564_v25  ;;  %vm563_vm12 = vcmp.eq.f32.partialorder %v562_v27, 8.507059e+37 }
 0x355   :  { %665 = vst [vmem:[%s1277_s5 + $0x38] sm:$0xff] %v537_v5  ;;  %v541_v19 = vmul.f32 %v779_v54, %v540_v48 }
 0x357   :  { %v542_v21 = vadd.f32 %v779_v54, %v541_v19 }
 0x358   :  { %v781_v62 = vpop.eup %780 }
 0x359   :  { %v546_v16 = vsel %vm545_vm7, %v779_v54, %v542_v21  ;;  %v554_v17 = vmul.f32 %v781_v62, %v405_v52  ;;  %v407_v18 = vpop.xlane.xlu2 %406  ;;  %vm559_vm9 = vweird.f32 %v781_v62 }
 0x35a   :  { %v551_v20 = vsel %vm548_vm8, %v550_v0, %v546_v16  ;;  %782 = vrcp.f32 %v407_v18  ;;  %v417_v9 = vpop.xlane.xlu1 %416  ;;  %vm560_vm11 = vmor %vm558_vm10, %vm559_vm9  ;;  %v579_v10 = vand.u32 2147483648, %v407_v18  ;;  %v577_v14 = vand.u32 2147483647, %v407_v18 }
 0x35b   :  { %v552_v22 = vmul.f32 %v1175_v13, %v551_v20  ;;  %v555_v23 = vsub.f32 1.0, %v554_v17  ;;  %784 = vrcp.f32 %v417_v9  ;;  %v654_v32 = vand.u32 2147483648, %v417_v9 }
 0x35c   :  { %v652_v28 = vand.u32 2147483647, %v417_v9  ;;  %vm573_vm15 = vweird.f32 %v407_v18  ;;  %vm648_vm1 = vweird.f32 %v417_v9  ;;  %vm578_vm2 = vcmp.eq.f32.partialorder %v577_v14, 8.507059e+37 }
 0x35d   :  { %666 = vst [vmem:[%s1277_s5 + $0x40] sm:$0xff] %v552_v22  ;;  %v556_v26 = vmul.f32 %v781_v62, %v555_v23  ;;  %v655_v36 = vor.u32 1.1754944e-38, %v654_v32 }
 0x35e   :  { %vm653_vm4 = vcmp.eq.f32.partialorder %v652_v28, 8.507059e+37 }
 0x35f   :  { %v557_v37 = vadd.f32 %v781_v62, %v556_v26 }
 0x360   :  { %v783_v42 = vpop.eup %782 }
 0x361   :  { %v785_v24 = vpop.eup %784  ;;  %v561_v2 = vsel %vm560_vm11, %v781_v62, %v557_v37  ;;  %v569_v3 = vmul.f32 %v783_v42, %v407_v18  ;;  %v1241_v13 = vpop.xlane.xlu0 %408  ;;  %vm574_vm13 = vweird.f32 %v783_v42 }
 0x362   :  { %v566_v4 = vsel %vm563_vm12, %v565_v44, %v561_v2  ;;  %v644_v6 = vmul.f32 %v785_v24, %v417_v9  ;;  %v413_v58 = vpop.xlane.xlu2 %412  ;;  %786 = vrcp.f32 %v1241_v13  ;;  %vm649_vm14 = vweird.f32 %v785_v24  ;;  %vm575_vm0 = vmor %vm573_vm15, %vm574_vm13 }
 0x363   :  { %v567_v7 = vmul.f32 %v1180_v31, %v566_v4  ;;  %v570_v8 = vsub.f32 1.0, %v569_v3  ;;  %788 = vrcp.f32 %v413_v58  ;;  %v580_v31 = vor.u32 1.1754944e-38, %v579_v10  ;;  %vm650_vm3 = vmor %vm648_vm1, %vm649_vm14 }
 0x364   :  { %v645_v11 = vsub.f32 1.0, %v644_v6  ;;  %v594_v55 = vand.u32 2147483648, %v1241_v13  ;;  %v624_v56 = vand.u32 2147483648, %v413_v58  ;;  %v592_v52 = vand.u32 2147483647, %v1241_v13 }
 0x365   :  { %667 = vst [vmem:[%s1277_s5 + $0x48] sm:$0xff] %v567_v7  ;;  %v571_v12 = vmul.f32 %v783_v42, %v570_v8  ;;  %v622_v59 = vand.u32 2147483647, %v413_v58  ;;  %vm588_vm7 = vweird.f32 %v1241_v13  ;;  %vm618_vm8 = vweird.f32 %v413_v58 }
 0x366   :  { %v646_v15 = vmul.f32 %v785_v24, %v645_v11  ;;  %v595_v48 = vor.u32 1.1754944e-38, %v594_v55  ;;  %v625_v19 = vor.u32 1.1754944e-38, %v624_v56  ;;  %vm593_vm11 = vcmp.eq.f32.partialorder %v592_v52, 8.507059e+37 }
 0x367   :  { %v572_v29 = vadd.f32 %v783_v42, %v571_v12  ;;  %vm623_vm12 = vcmp.eq.f32.partialorder %v622_v59, 8.507059e+37 }
 0x368   :  { %v787_v30 = vpop.eup %786  ;;  %v647_v33 = vadd.f32 %v785_v24, %v646_v15 }
 0x369   :  { %v789_v34 = vpop.eup %788  ;;  %v576_v35 = vsel %vm575_vm0, %v783_v42, %v572_v29  ;;  %v584_v63 = vmul.f32 %v787_v30, %v1241_v13  ;;  %v415_v38 = vpop.xlane.xlu0 %414  ;;  %vm589_vm5 = vweird.f32 %v787_v30 }
 0x36a   :  { %v581_v39 = vsel %vm578_vm2, %v580_v31, %v576_v35  ;;  %v651_v1 = vsel %vm650_vm3, %v785_v24, %v647_v33  ;;  %v614_v45 = vmul.f32 %v789_v34, %v413_v58  ;;  %790 = vrcp.f32 %v415_v38  ;;  %vm590_vm9 = vmor %vm588_vm7, %vm589_vm5 }
 0x36b   :  { %v582_v43 = vmul.f32 %v1185_v40, %v581_v39  ;;  %v656_v41 = vsel %vm653_vm4, %v655_v36, %v651_v1  ;;  %v585_v47 = vsub.f32 1.0, %v584_v63  ;;  %vm619_vm6 = vweird.f32 %v789_v34 }
 0x36c   :  { %v657_v49 = vmul.f32 %v1187_v46, %v656_v41  ;;  %v615_v54 = vsub.f32 1.0, %v614_v45  ;;  %vm620_vm10 = vmor %vm618_vm8, %vm619_vm6  ;;  %v639_v9 = vand.u32 2147483648, %v415_v38  ;;  %v637_v23 = vand.u32 2147483647, %v415_v38 }
 0x36d   :  { %668 = vst [vmem:[%s1277_s5 + $0x50] sm:$0xff] %v582_v43  ;;  %v586_v57 = vmul.f32 %v787_v30, %v585_v47  ;;  %vm633_vm14 = vweird.f32 %v415_v38 }
 0x36e   :  { %673 = vst [vmem:[%s1277_s5 + $0x78] sm:$0xff] %v657_v49  ;;  %v616_v40 = vmul.f32 %v789_v34, %v615_v54  ;;  %v640_v26 = vor.u32 1.1754944e-38, %v639_v9  ;;  %vm638_vm0 = vcmp.eq.f32.partialorder %v637_v23, 8.507059e+37 }
 0x36f   :  { %v587_v46 = vadd.f32 %v787_v30, %v586_v57 }
 0x370   :  { %v617_v5 = vadd.f32 %v789_v34, %v616_v40  ;;  %v791_v60 = vpop.eup %790 }
 0x371   :  { %v591_v61 = vsel %vm590_vm9, %v787_v30, %v587_v46  ;;  %v629_v0 = vmul.f32 %v791_v60, %v415_v38  ;;  %vm634_vm13 = vweird.f32 %v791_v60 }
 0x372   :  { %v621_v21 = vsel %vm620_vm10, %v789_v34, %v617_v5  ;;  %v596_v62 = vsel %vm593_vm11, %v595_v48, %v591_v61  ;;  %vm635_vm15 = vmor %vm633_vm14, %vm634_vm13 }
 0x373   :  { %v626_v16 = vsel %vm623_vm12, %v625_v19, %v621_v21  ;;  %v597_v17 = vmul.f32 %v1192_v51, %v596_v62  ;;  %v630_v20 = vsub.f32 1.0, %v629_v0 }
 0x374   :  { %v627_v18 = vmul.f32 %v1194_v53, %v626_v16 }
 0x375   :  { %669 = vst [vmem:[%s1277_s5 + $0x58] sm:$0xff] %v597_v17  ;;  %v631_v22 = vmul.f32 %v791_v60, %v630_v20 }
 0x376   :  { %671 = vst [vmem:[%s1277_s5 + $0x68] sm:$0xff] %v627_v18 }
 0x377   :  { %v632_v25 = vadd.f32 %v791_v60, %v631_v22 }
 0x379   :  { %v636_v51 = vsel %vm635_vm15, %v791_v60, %v632_v25 }
 0x37a   :  { %v641_v53 = vsel %vm638_vm0, %v640_v26, %v636_v51 }
 0x37b   :  { %v642_v27 = vmul.f32 %v1198_v50, %v641_v53 }
 0x37d   :  { %672 = vst [vmem:[%s1277_s5 + $0x70] sm:$0xff] %v642_v27 }

</bundles_post_ra>
